<compile_context>
chip_gen: v6e
topology: v6e:2x2x1
jax: 0.10.0
libtpu: 0.0.40
codegen_flags: <defaults>
</compile_context>

<pallas_src>
import functools

import jax
import jax.numpy as jnp
from jax.experimental import pallas as pl
from jax.experimental.pallas import tpu as pltpu

_NEG_LARGE = -1.0e30   # finite "-inf" for padded action columns (exp -> 0)
_ALIGN = 16            # row-tile sublane alignment (safe for bf16 outputs)


def _round_up(v, m):
    return (v + m - 1) // m * m


def _vmem_capacity_bytes():
    try:
        return int(pltpu.get_tpu_info().vmem_capacity_bytes)
    except Exception:
        return 64 * 1024 * 1024  # conservative fallback (v7x per-TC VMEM)


# ----------------------------------------------------------------------------
# Kernel
# ----------------------------------------------------------------------------
def _policy_head_kernel(x_ref, w_ref, b_ref, logits_ref, probs_ref, acc_ref):
    # x_ref: (rt, kt) native dtype, w_ref: (kt, a_pad) bf16, b_ref: (1, a_pad) f32
    k = pl.program_id(1)

    @pl.when(k == 0)
    def _():
        acc_ref[...] = jnp.zeros_like(acc_ref)

    # Cast to bf16 just before the MXU; f32 accumulation in scratch.
    acc_ref[...] += jnp.dot(
        x_ref[...].astype(jnp.bfloat16), w_ref[...],
        preferred_element_type=jnp.float32)

    @pl.when(k == pl.num_programs(1) - 1)
    def _():
        y = acc_ref[...] + b_ref[...]           # padded cols carry -1e30 bias
        m = jnp.max(y, axis=-1, keepdims=True)
        e = jnp.exp(y - m)                      # single EUP exp pass
        s = jnp.sum(e, axis=-1, keepdims=True)
        # logits = y - logsumexp(y);  probs = e / s  (no second exp).
        logits_ref[...] = ((y - m) - jnp.log(s)).astype(logits_ref.dtype)
        probs_ref[...] = (e * pl.reciprocal(s, approx=True)).astype(probs_ref.dtype)


# ----------------------------------------------------------------------------
# Tiling selection
# ----------------------------------------------------------------------------
def _choose_tiling(rows, d_model, a_pad, x_bytes, row_tile, budget):
    def need(rt, kt, w_bufs):
        return (2 * rt * kt * x_bytes            # x (double buffered)
                + w_bufs * kt * a_pad * 2        # weight (bf16)
                + 2 * a_pad * 4                  # bias
                + 2 * rt * a_pad * 4             # logits out f32 (double buffered)
                + 2 * rt * a_pad * 2             # probs out bf16 (double buffered)
                + rt * a_pad * 4                 # f32 accumulator scratch
                + 4 * rt * a_pad * 4)            # in-kernel f32 temporaries headroom

    rows_a = _round_up(max(rows, 1), _ALIGN)
    rt = _round_up(min(row_tile, rows_a), _ALIGN)
    kt, w_bufs = d_model, 1

    # Shrink the row tile first.
    while rt > _ALIGN and need(rt, kt, w_bufs) > budget:
        rt = max(_ALIGN, _round_up(rt // 2, _ALIGN))

    # If the resident weight alone still blows the budget, split the reduction
    # dim with a K grid axis instead of shrinking rows further.
    if need(rt, kt, w_bufs) > budget and d_model % 128 == 0 and d_model > 128:
        cands = [c for c in range(d_model - 128, 127, -128) if d_model % c == 0]
        if cands:
            w_bufs = 2
            kt = cands[-1]
            for c in cands:                      # largest kt that fits
                if need(rt, c, w_bufs) <= budget:
                    kt = c
                    break

    # v7x megacore: prefer an even number of row steps, >=4 when rows permit.
    r_steps = pl.cdiv(rows, rt)
    if rows > _ALIGN:
        target = 4 if rows >= 4 * _ALIGN else 2
        if r_steps < target:
            rt = _round_up(pl.cdiv(rows, target), _ALIGN)
            r_steps = pl.cdiv(rows, rt)
        if r_steps > 1 and r_steps % 2 == 1:
            rt2 = _round_up(pl.cdiv(rows, r_steps + 1), _ALIGN)
            if rt2 >= _ALIGN and pl.cdiv(rows, rt2) % 2 == 0:
                rt = rt2

    return rt, kt, w_bufs, need(rt, kt, w_bufs)


# ----------------------------------------------------------------------------
# Parameter prep (one-time, outside the per-call jit)
# ----------------------------------------------------------------------------
def prepare_policy_head_params(weight, bias):
    """weight: [d_model, action_dim] (transposed nn.Linear weight), bias: [action_dim].
    Returns (bf16 weight [d_model, a_pad], f32 bias [1, a_pad]); padded bias
    columns are -1e30 so softmax puts zero mass there."""
    d_model, action_dim = weight.shape
    a_pad = _round_up(max(action_dim, 1), 128)
    w = weight.astype(jnp.bfloat16)
    b = bias.astype(jnp.float32)
    if a_pad != action_dim:
        w = jnp.pad(w, ((0, 0), (0, a_pad - action_dim)))
        b = jnp.pad(b, (0, a_pad - action_dim), constant_values=_NEG_LARGE)
    return w, b.reshape(1, a_pad)


# ----------------------------------------------------------------------------
# Forward
# ----------------------------------------------------------------------------
@functools.partial(jax.jit, static_argnames=("action_dim", "row_tile", "return_padded"))
def policy_head_forward(x, w_pad, b_pad, *, action_dim, row_tile=1024,
                        return_padded=False):
    """x: [..., d_model] -> (normalized_logits f32, probs bf16), each
    [..., action_dim]  (or [..., a_pad] when return_padded=True, which skips
    the post-kernel column-slice copy)."""
    d_model = x.shape[-1]
    a_pad = w_pad.shape[1]
    lead_shape = x.shape[:-1]
    rows = 1
    for d in lead_shape:
        rows *= d

    x2 = x.reshape(rows, d_model)   # metadata-only under jit, no HBM pass

    vmem_cap = _vmem_capacity_bytes()
    budget = int(vmem_cap * 0.70)   # headroom for Mosaic internal scratch
    rt, kt, w_bufs, vneed = _choose_tiling(
        rows, d_model, a_pad, x2.dtype.itemsize, row_tile, budget)
    k_steps = max(1, d_model // kt)
    r_steps = pl.cdiv(rows, rt)

    vmem_limit = int(min(max(int(1.4 * vneed), 32 * 1024 * 1024), vmem_cap))

    # Constant blocks are single-buffered (second buffer is wasted VMEM).
    if k_steps == 1:
        w_spec = pl.BlockSpec((kt, a_pad), lambda i, k: (0, 0),
                              pipeline_mode=pl.Buffered(1))
    else:
        w_spec = pl.BlockSpec((kt, a_pad), lambda i, k: (k, 0))
    b_spec = pl.BlockSpec((1, a_pad), lambda i, k: (0, 0),
                          pipeline_mode=pl.Buffered(1))

    cost = pl.CostEstimate(
        flops=2 * rows * d_model * a_pad,
        transcendentals=rows * a_pad + 2 * rows,
        bytes_accessed=(rows * d_model * x2.dtype.itemsize
                        + d_model * a_pad * 2 + a_pad * 4
                        + rows * a_pad * (4 + 2)))

    logits, probs = pl.pallas_call(
        _policy_head_kernel,
        out_shape=(
            jax.ShapeDtypeStruct((rows, a_pad), jnp.float32),
            jax.ShapeDtypeStruct((rows, a_pad), jnp.bfloat16),
        ),
        grid_spec=pltpu.PrefetchScalarGridSpec(
            num_scalar_prefetch=0,
            grid=(r_steps, k_steps),
            in_specs=[
                pl.BlockSpec((rt, kt), lambda i, k: (i, k)),
                w_spec,
                b_spec,
            ],
            out_specs=[
                pl.BlockSpec((rt, a_pad), lambda i, k: (i, 0)),
                pl.BlockSpec((rt, a_pad), lambda i, k: (i, 0)),
            ],
            scratch_shapes=[pltpu.VMEM((rt, a_pad), jnp.float32)],
        ),
        compiler_params=pltpu.CompilerParams(
            dimension_semantics=("parallel", "arbitrary"),
            vmem_limit_bytes=vmem_limit,
        ),
        cost_estimate=cost,
    )(x2, w_pad, b_pad)

    if return_padded:
        return (logits.reshape(*lead_shape, a_pad),
                probs.reshape(*lead_shape, a_pad))
    # Column slice is a real copy only when action_dim % 128 != 0.
    logits = logits[:, :action_dim].reshape(*lead_shape, action_dim)
    probs = probs[:, :action_dim].reshape(*lead_shape, action_dim)
    return logits, probs


# ----------------------------------------------------------------------------
# Init + reference
# ----------------------------------------------------------------------------
def init_policy_head_params(key, d_model, action_dim):
    """nn.Linear-style init: U(-1/sqrt(d_model), 1/sqrt(d_model))."""
    kw, kb = jax.random.split(key)
    bound = 1.0 / (d_model ** 0.5)
    weight = jax.random.uniform(
        kw, (d_model, action_dim), jnp.float32, minval=-bound, maxval=bound)
    bias = jax.random.uniform(
        kb, (action_dim,), jnp.float32, minval=-bound, maxval=bound)
    return weight, bias


def _reference(x, weight, bias):
    # Match the kernel's bf16 MXU inputs + f32 accumulation.
    xb = x.astype(jnp.bfloat16).astype(jnp.float32)
    wb = weight.astype(jnp.bfloat16).astype(jnp.float32)
    y = xb @ wb + bias
    logits = y - jax.scipy.special.logsumexp(y, axis=-1, keepdims=True)
    probs = jax.nn.softmax(y, axis=-1)
    return logits, probs


if __name__ == "__main__":
    key = jax.random.PRNGKey(0)
    k_x, k_p, k_x2, k_x3 = jax.random.split(key, 4)

    batch, seq, d_model, action_dim = 2, 8, 32, 16
    x = jax.random.normal(k_x, (batch, seq, d_model), jnp.float32)
    weight, bias = init_policy_head_params(k_p, d_model, action_dim)
    w_pad, b_pad = prepare_policy_head_params(weight, bias)   # one-time prep

    logits, probs = policy_head_forward(x, w_pad, b_pad, action_dim=action_dim)
    jax.block_until_ready((logits, probs))

    logits_ref, probs_ref = _reference(x, weight, bias)
    assert logits.shape == (batch, seq, action_dim)
    assert probs.shape == (batch, seq, action_dim)
    assert jnp.allclose(logits, logits_ref, atol=3e-3), "logits mismatch"
    assert jnp.allclose(probs.astype(jnp.float32), probs_ref, atol=1e-2), "probs mismatch"
    assert jnp.allclose(jnp.sum(probs.astype(jnp.float32), axis=-1), 1.0, atol=2e-2)

    # Ragged rows (not a multiple of the tile / sublane): partial last block.
    x_odd = jax.random.normal(k_x2, (3, 5, d_model), jnp.float32)
    lo2, pr2 = policy_head_forward(x_odd, w_pad, b_pad, action_dim=action_dim)
    jax.block_until_ready((lo2, pr2))
    lo2_ref, pr2_ref = _reference(x_odd, weight, bias)
    assert lo2.shape == (3, 5, action_dim)
    assert jnp.allclose(lo2, lo2_ref, atol=3e-3), "odd-rows logits mismatch"
    assert jnp.allclose(pr2.astype(jnp.float32), pr2_ref, atol=1e-2), "odd-rows probs mismatch"

    # Larger batch: exercises the multi-step (even, >=4) row grid.
    x_big = jax.random.normal(k_x3, (4, 16, d_model), jnp.float32)
    lo3, pr3 = policy_head_forward(x_big, w_pad, b_pad, action_dim=action_dim)
    jax.block_until_ready((lo3, pr3))
    lo3_ref, pr3_ref = _reference(x_big, weight, bias)
    assert lo3.shape == (4, 16, action_dim)
    assert jnp.allclose(lo3, lo3_ref, atol=3e-3), "big-batch logits mismatch"
    assert jnp.allclose(pr3.astype(jnp.float32), pr3_ref, atol=1e-2), "big-batch probs mismatch"

    print("KERNEL_OK")
</pallas_src>

<mosaic_0001>
module attributes {stable_mosaic.version = 11 : i64} {
  func.func @_policy_head_kernel(%arg0: i32, %arg1: i32, %arg2: memref<16x32xf32, #tpu.memory_space<vmem>>, %arg3: memref<32x128xbf16, #tpu.memory_space<vmem>>, %arg4: memref<1x128xf32, #tpu.memory_space<vmem>>, %arg5: memref<16x128xf32, #tpu.memory_space<vmem>>, %arg6: memref<16x128xbf16, #tpu.memory_space<vmem>>, %arg7: memref<16x128xf32, #tpu.memory_space<vmem>>) attributes {dimension_semantics = [#tpu.dimension_semantics<parallel>, #tpu.dimension_semantics<arbitrary>], iteration_bounds = array<i64: 1, 1>, scalar_prefetch = 0 : i64, scratch_operands = 1 : i64, tpu.core_type = #tpu.core_type<tc>, window_params = [{transform_indices = @transform_0, window_bounds = array<i64: 16, 32>}, {pipeline_mode = #tpu.pipeline_mode<synchronous>, transform_indices = @transform_1, window_bounds = array<i64: 32, 128>}, {pipeline_mode = #tpu.pipeline_mode<synchronous>, transform_indices = @transform_2, window_bounds = array<i64: 1, 128>}, {transform_indices = @transform_3, window_bounds = array<i64: 16, 128>}, {transform_indices = @transform_4, window_bounds = array<i64: 16, 128>}]} {
    %c0_i32 = arith.constant 0 : i32
    %0 = arith.cmpi eq, %arg1, %c0_i32 : i32
    %1 = arith.extui %0 : i1 to i32
    %c0_i32_0 = arith.constant 0 : i32
    %2 = arith.cmpi ne, %1, %c0_i32_0 : i32
    scf.if %2 {
      %cst_10 = arith.constant 0.000000e+00 : f32
      %13 = vector.broadcast %cst_10 : f32 to vector<16x128xf32>
      %c0_11 = arith.constant 0 : index
      %c0_12 = arith.constant 0 : index
      %14 = vector.load %arg7[%c0_11, %c0_12] : memref<16x128xf32, #tpu.memory_space<vmem>>, vector<16x128xf32>
      tpu.vector_store %arg7[%c0_11, %c0_12], %13 {strides = array<i32>} : memref<16x128xf32, #tpu.memory_space<vmem>>, vector<16x128xf32>,
    } else {
    }
    %c0 = arith.constant 0 : index
    %c0_1 = arith.constant 0 : index
    %3 = vector.load %arg7[%c0, %c0_1] : memref<16x128xf32, #tpu.memory_space<vmem>>, vector<16x128xf32>
    %c0_2 = arith.constant 0 : index
    %c0_3 = arith.constant 0 : index
    %4 = vector.load %arg2[%c0_2, %c0_3] : memref<16x32xf32, #tpu.memory_space<vmem>>, vector<16x32xf32>
    %5 = arith.truncf %4 : vector<16x32xf32> to vector<16x32xbf16>
    %c0_4 = arith.constant 0 : index
    %c0_5 = arith.constant 0 : index
    %6 = vector.load %arg3[%c0_4, %c0_5] : memref<32x128xbf16, #tpu.memory_space<vmem>>, vector<32x128xbf16>
    %cst = arith.constant dense<0.000000e+00> : vector<16x128xf32>
    %7 = tpu.matmul %5, %6, %cst {dimension_numbers = #tpu.dot_dimension_numbers<[1], [0], [0], [1], [0, 0, 1, 1], [], []>} : vector<16x32xbf16>, vector<32x128xbf16>, vector<16x128xf32> -> vector<16x128xf32>
    %8 = arith.addf %3, %7 : vector<16x128xf32>
    %c0_6 = arith.constant 0 : index
    %c0_7 = arith.constant 0 : index
    %9 = vector.load %arg7[%c0_6, %c0_7] : memref<16x128xf32, #tpu.memory_space<vmem>>, vector<16x128xf32>
    tpu.vector_store %arg7[%c0_6, %c0_7], %8 {strides = array<i32>} : memref<16x128xf32, #tpu.memory_space<vmem>>, vector<16x128xf32>,
    %c0_i32_8 = arith.constant 0 : i32
    %10 = arith.cmpi eq, %arg1, %c0_i32_8 : i32
    %11 = arith.extui %10 : i1 to i32
    %c0_i32_9 = arith.constant 0 : i32
    %12 = arith.cmpi ne, %11, %c0_i32_9 : i32
    scf.if %12 {
      %c0_10 = arith.constant 0 : index
      %c0_11 = arith.constant 0 : index
      %13 = vector.load %arg7[%c0_10, %c0_11] : memref<16x128xf32, #tpu.memory_space<vmem>>, vector<16x128xf32>
      %c0_12 = arith.constant 0 : index
      %c0_13 = arith.constant 0 : index
      %14 = vector.load %arg4[%c0_12, %c0_13] : memref<1x128xf32, #tpu.memory_space<vmem>>, vector<1x128xf32>
      %15 = vector.broadcast %14 : vector<1x128xf32> to vector<16x128xf32>
      %16 = arith.addf %13, %15 : vector<16x128xf32>
      %cst_14 = arith.constant dense<0xFF800000> : vector<16xf32>
      %17 = vector.multi_reduction <maximumf>, %16, %cst_14 [1] : vector<16x128xf32> to vector<16xf32>
      %18 = vector.shape_cast %17 : vector<16xf32> to vector<16x1xf32>
      %19 = vector.broadcast %18 : vector<16x1xf32> to vector<16x128xf32>
      %20 = arith.subf %16, %19 : vector<16x128xf32>
      %21 = math.exp %20 : vector<16x128xf32>
      %cst_15 = arith.constant dense<0.000000e+00> : vector<16xf32>
      %22 = vector.multi_reduction <add>, %21, %cst_15 [1] : vector<16x128xf32> to vector<16xf32>
      %23 = vector.shape_cast %22 : vector<16xf32> to vector<16x1xf32>
      %24 = vector.broadcast %18 : vector<16x1xf32> to vector<16x128xf32>
      %25 = arith.subf %16, %24 : vector<16x128xf32>
      %26 = math.log %23 : vector<16x1xf32>
      %27 = vector.broadcast %26 : vector<16x1xf32> to vector<16x128xf32>
      %28 = arith.subf %25, %27 : vector<16x128xf32>
      %c0_16 = arith.constant 0 : index
      %c0_17 = arith.constant 0 : index
      %29 = vector.load %arg5[%c0_16, %c0_17] : memref<16x128xf32, #tpu.memory_space<vmem>>, vector<16x128xf32>
      tpu.vector_store %arg5[%c0_16, %c0_17], %28 {strides = array<i32>} : memref<16x128xf32, #tpu.memory_space<vmem>>, vector<16x128xf32>,
      %30 = tpu.reciprocal %23 {approx = true} : vector<16x1xf32> -> vector<16x1xf32>
      %31 = vector.broadcast %30 : vector<16x1xf32> to vector<16x128xf32>
      %32 = arith.mulf %21, %31 : vector<16x128xf32>
      %33 = arith.truncf %32 : vector<16x128xf32> to vector<16x128xbf16>
      %c0_18 = arith.constant 0 : index
      %c0_19 = arith.constant 0 : index
      %34 = vector.load %arg6[%c0_18, %c0_19] : memref<16x128xbf16, #tpu.memory_space<vmem>>, vector<16x128xbf16>
      tpu.vector_store %arg6[%c0_18, %c0_19], %33 {strides = array<i32>} : memref<16x128xbf16, #tpu.memory_space<vmem>>, vector<16x128xbf16>,
    } else {
    }
    return
  }
  func.func @transform_0(%arg0: i32, %arg1: i32) -> (i32, i32) {
    %c0_i32 = arith.constant 0 : i32
    return %arg0, %arg1 : i32, i32
  }
  func.func @transform_1(%arg0: i32, %arg1: i32) -> (i32, i32) {
    %c0_i32 = arith.constant 0 : i32
    %c0_i32_0 = arith.constant 0 : i32
    %c0_i32_1 = arith.constant 0 : i32
    return %c0_i32, %c0_i32_0 : i32, i32
  }
  func.func @transform_2(%arg0: i32, %arg1: i32) -> (i32, i32) {
    %c0_i32 = arith.constant 0 : i32
    %c0_i32_0 = arith.constant 0 : i32
    %c0_i32_1 = arith.constant 0 : i32
    return %c0_i32, %c0_i32_0 : i32, i32
  }
  func.func @transform_3(%arg0: i32, %arg1: i32) -> (i32, i32) {
    %c0_i32 = arith.constant 0 : i32
    %c0_i32_0 = arith.constant 0 : i32
    return %arg0, %c0_i32 : i32, i32
  }
  func.func @transform_4(%arg0: i32, %arg1: i32) -> (i32, i32) {
    %c0_i32 = arith.constant 0 : i32
    %c0_i32_0 = arith.constant 0 : i32
    return %arg0, %c0_i32 : i32, i32
  }
}

</mosaic_0001>

<bundles_post_ra>
// kernel: policy_head_forward.1
= control target key start
LH: loop header
LB: loop body
LE: loop exit
PB: predicated region body
PF: predicated region fallthrough
CT: control target
= control target key end

     0   :  { %10 = vsyncpa [#allocation4], 0  ;;  %s322_s0 = inlined_call_operand.hbm [shape: f32[16,32], index: 0, kind: input, shape index: {}]   ;;  %s323_s1 = inlined_call_operand.hbm [shape: bf16[32,128], index: 1, kind: input, shape index: {}]   ;;  %s324_s2 = inlined_call_operand.vmem [shape: f32[1,128], index: 2, kind: input, shape index: {}]   ;;  %s325_s3 = inlined_call_operand.vmem [shape: f32[16,128], index: 3, kind: output, shape index: {0}]   ;;  %s326_s4 = inlined_call_operand.vmem [shape: bf16[16,128], index: 4, kind: output, shape index: {1}]  }
   0x1   :  { %11 = vsyncpa [#allocation6], 0  ;;  %s271_s15 = smov [#allocation3]  }
   0x2   :  { %s17_s16 = sshll.u32 %s271_s15, 4  ;;  %s18_s16 = int_to_ptr.vmem [resolvable:$true] %s17_s16 }
   0x3   :  { %s235_s17 = scalar_lea.vmem %s18_s16, 256  ;;  %p240_p1 = scmp.lt.s32.totalorder %s18_s16, %s18_s16 }
   0x4   :  { %p236_p0 = scmp.ne.s32.totalorder %s18_s16, %s235_s17  ;;  %p241_p2 = scmp.lt.s32.totalorder %s235_s17, %s235_s17 }
   0x6   :  { %p242_p3 = por %p241_p2, %p240_p1 }
   0x8   :  { %p243_p4 = pnand %p242_p3, %p236_p0 }
   0xa   :  { %246 = shalt.err (!%p243_p4)
}
   0xb   :  { %s272_s18 = smov 128   ;;  %s273_s19 = smov 8  }
   0xc   :  { %23 = dma.hbm_to_vmem [thread:$0]  %s322_s0, 256, %s18_s16, [#allocation4], %s272_s18, %s272_s18, %s273_s19  }
   0xd   :  { %s274_s22 = smov [#allocation5]  }
   0xe   :  { %s29_s23 = sshll.u32 %s274_s22, 4  ;;  %s30_s23 = int_to_ptr.vmem [resolvable:$true] %s29_s23 }
   0xf   :  { %s255_s24 = scalar_lea.vmem %s30_s23, 256  ;;  %p260_p6 = scmp.lt.s32.totalorder %s30_s23, %s30_s23 }
  0x10   :  { %p256_p5 = scmp.ne.s32.totalorder %s30_s23, %s255_s24  ;;  %p261_p7 = scmp.lt.s32.totalorder %s255_s24, %s255_s24 }
  0x12   :  { %p262_p8 = por %p261_p7, %p260_p6 }
  0x14   :  { %p263_p9 = pnand %p262_p8, %p256_p5 }
  0x16   :  { %266 = shalt.err (!%p263_p9)
}
  0x17   :  { %s275_s25 = smov 64   ;;  %s276_s26 = smov 4  }
  0x18   :  { %35 = dma.hbm_to_vmem [thread:$0]  %s323_s1, 256, %s30_s23, [#allocation6], %s275_s25, %s275_s25, %s276_s26  }
  0x19   :  { %267 = dma.done.wait [#allocation4], 256  }
  0x1a   :  { %268 = vsyncadd [#allocation4], 4294967040 }
  0x1b   :  { %269 = dma.done.wait [#allocation6], 256  }
  0x1c   :  { %270 = vsyncadd [#allocation6], 4294967040  ;;  %v277_v0 = vmov 0.0   ;;  %vm278_vm0 = vmmov 0   ;;  %v213_v1 = vld [vmem:[#allocation5 + $0x8] sm:$0xff]   ;;  %v214_v2 = vld [vmem:[#allocation5] sm:$0xff]  }
  0x1d   :  { %197 = vmatprep.subr.bf16.mxu0 %v277_v0  ;;  %201 = vmatprep.mubr.msk.bf16.mxu0 %vm278_vm0, %v277_v0  ;;  %v53_v3 = vld [vmem:[#allocation3] sm:$0xff]  ;;  %v54_v4 = vld [vmem:[#allocation3 + $0x8] sm:$0xff]  ;;  %vm72_vm1 = vcmask 261120  }
  0x1e   :  { %198 = vmatpush3.bf16.msra.mxu0 %v213_v1  ;;  %v55_v5 = vpack.c.bf16 %v54_v4, %v53_v3  ;;  %v184_v6 = vld [vmem:[%s324_s2] ss:$0 sm:$0xff] }
  0x1f   :  { %199 = vmatprep.subr.bf16.mxu0 %v277_v0 }
  0x22   :  { %200 = vmatpush3.bf16.msra.mxu0 %v214_v2 }
  0x25   :  { %202 = vmatmul.mubr.msk.bf16.vlgmr.msra.gmra.mxu0 %vm72_vm1, %v55_v5 }
  0xe5   :  { %v110_v7 = vpop.f32.mrf.mxu0 }
  0xe6   :  { %v133_v8 = vadd.f32 %v184_v6, %v110_v7 }
  0xe7   :  { %v203_v9 = vpop.f32.mrf.mxu0 }
  0xe8   :  { %135 = vmax.xlane.f32.xlu0 %v133_v8 }
  0xe9   :  { %v113_v10 = vpop.f32.mrf.mxu0 }
  0xea   :  { %v134_v11 = vadd.f32 %v184_v6, %v113_v10 }
  0xeb   :  { %v204_v12 = vpop.f32.mrf.mxu0 }
  0xec   :  { %137 = vmax.xlane.f32.xlu0 %v134_v11 }
 0x171   :  { %v136_v13 = vpop.xlane.xlu0 %135 }
 0x172   :  { %v139_v14 = vsub.f32 %v133_v8, %v136_v13 }
 0x174   :  { %v141_v15 = vmul.f32 1.442695, %v139_v14 }
 0x175   :  { %v138_v16 = vpop.xlane.xlu0 %137 }
 0x176   :  { %215 = vpow2.f32 %v141_v15  ;;  %v140_v17 = vsub.f32 %v134_v11, %v138_v16 }
 0x178   :  { %v143_v18 = vmul.f32 1.442695, %v140_v17 }
 0x17a   :  { %217 = vpow2.f32 %v143_v18 }
 0x183   :  { %v216_v19 = vpop.eup %215 }
 0x184   :  { %145 = vadd.xlane.f32.xlu1 %v216_v19 }
 0x187   :  { %v218_v20 = vpop.eup %217 }
 0x188   :  { %147 = vadd.xlane.f32.xlu1 %v218_v20 }
 0x20d   :  { %v146_v21 = vpop.xlane.xlu1 %145 }
 0x20e   :  { %219 = vlog2.f32 %v146_v21 }
 0x20f   :  { %221 = vrcp.f32 %v146_v21 }
 0x211   :  { %v148_v22 = vpop.xlane.xlu1 %147 }
 0x212   :  { %223 = vlog2.f32 %v148_v22 }
 0x213   :  { %225 = vrcp.f32 %v148_v22 }
 0x21b   :  { %v220_v23 = vpop.eup %219 }
 0x21c   :  { %v150_v24 = vmul.f32 0.6931472, %v220_v23  ;;  %v222_v25 = vpop.eup %221 }
 0x21d   :  { %v159_v30 = vmul.f32 %v222_v25, %v216_v19 }
 0x21e   :  { %v153_v26 = vsub.f32 %v139_v14, %v150_v24 }
 0x21f   :  { %v224_v27 = vpop.eup %223 }
 0x220   :  { %v226_v28 = vpop.eup %225  ;;  %155 = vst [vmem:[%s325_s3] sm:$0xff] %v153_v26  ;;  %v152_v29 = vmul.f32 0.6931472, %v224_v27 }
 0x221   :  { %v160_v31 = vmul.f32 %v226_v28, %v218_v20 }
 0x222   :  { %v154_v32 = vsub.f32 %v140_v17, %v152_v29 }
 0x223   :  { %v192_v33 = vpack.c.bf16 %v160_v31, %v159_v30 }
 0x224   :  { %156 = vst [vmem:[%s325_s3 + $0x8] sm:$0xff] %v154_v32 }
 0x225   :  { %193 = vst [vmem:[%s326_s4] sm:$0xff] %v192_v33  }
 0x226   :  { %179 = vsyncpa [#allocation4], 1 }
 0x227   :  { %180 = vsyncpa [#allocation6], 1 }

</bundles_post_ra>
